<compile_context>
chip_gen: v5e
topology: v5e:2x2
jax: 0.10.0
libtpu: 0.0.40
codegen_flags: <defaults>
</compile_context>

<pallas_src>
import functools

import jax
import jax.numpy as jnp
from jax.experimental import pallas as pl
from jax.experimental.pallas import tpu as pltpu


def _round_up(x, m):
    return ((x + m - 1) // m) * m


def _layout(segments):
    """segments: [(name, width)] -> ({name: (offset, width)}, total padded to 128)."""
    off, cur = {}, 0
    for name, width in segments:
        off[name] = (cur, width)
        cur += width
    return off, _round_up(cur, 128)


# -----------------------------------------------------------------------------
# Fused forward kernel: embed + QKV(+RoPE) + attention + MLP + lm_head.
# Single grid step; batch folded into the sublane (row) axis.
# -----------------------------------------------------------------------------
def _fused_lm_kernel(w_h_ref, w_64_ref, c_ref, logits_ref, inter_ref, *,
                     n_heads, head_dim, vocab, woff, coff, sqrt_d):
    f32, bf16 = jnp.float32, jnp.bfloat16
    H = n_heads * head_dim
    c = c_ref[...]                                    # [BS, Wc] f32 constants
    BS = c.shape[0]

    def cseg(name):                                   # slice constants slab
        o, w = coff[name]
        return c[:, o:o + w]

    def wseg(name):                                   # slice H-row weight slab
        o, w = woff[name]
        return w_h_ref[:, o:o + w]

    # ---- token embedding fused as a one-hot MXU matmul (ids ride in the slab)
    ids = cseg("ids").astype(jnp.int32)               # [BS, 1]
    onehot = (jax.lax.broadcasted_iota(jnp.int32, (BS, vocab), 1) == ids)
    wte = w_64_ref[0:vocab, 0:H]                      # [V, H] bf16
    x = jnp.dot(onehot.astype(bf16), wte, preferred_element_type=f32)  # [BS, H]

    # ---- fused QKV projection; RoPE rotation + 1/sqrt(D) pre-folded on host --
    proj = jnp.dot(x.astype(bf16), wseg("w_qkv"),
                   preferred_element_type=f32) + cseg("b_qkv")         # [BS, 5H]
    q, q_r = proj[:, 0:H], proj[:, H:2 * H]
    k, k_r = proj[:, 2 * H:3 * H], proj[:, 3 * H:4 * H]
    v = proj[:, 4 * H:5 * H]
    cos, sin = cseg("cos"), cseg("sin")
    q_rot = q * cos + q_r * sin                       # already scaled by 1/sqrt(D)
    k_rot = k * cos + k_r * sin

    # ---- causal self-attention: all heads via head-major batched contractions
    def heads(t):                                     # [BS, H] -> [nH, BS, D]
        return jnp.stack(
            [t[:, h * head_dim:(h + 1) * head_dim] for h in range(n_heads)],
            axis=0)

    q3 = heads(q_rot).astype(bf16)
    k3 = heads(k_rot).astype(bf16)
    v3 = heads(v).astype(bf16)
    s = jnp.einsum("hqd,hkd->hqk", q3, k3, preferred_element_type=f32)
    s = s + cseg("bias")[None, :, :]                  # block-diagonal causal bias
    m = jnp.max(s, axis=-1, keepdims=True)
    p = jnp.exp(s - m)
    l = jnp.sum(p, axis=-1, keepdims=True)
    ctx = jnp.einsum("hqk,hkd->hqd", p.astype(bf16), v3,
                     preferred_element_type=f32)
    ctx = ctx * pl.reciprocal(l, approx=True)         # [nH, BS, D]

    # ---- output projection accumulated per head (no lane-axis concatenate) ---
    wo = wseg("w_o")                                  # [H, H] bf16, rows head-major
    wo3 = jnp.stack(
        [wo[h * head_dim:(h + 1) * head_dim, :] for h in range(n_heads)], axis=0)
    attn = jnp.einsum("hqd,hdo->hqo", ctx.astype(bf16), wo3,
                      preferred_element_type=f32)     # [nH, BS, H]
    attn_out = jnp.sum(attn, axis=0) + cseg("b_o")    # [BS, H]
    h1 = x + attn_out

    # ---- MLP (up, GELU, down) + residual -------------------------------------
    # TODO(synk): PyTorch nn.GELU defaults to erf; the tanh approximation is kept.
    up = jnp.dot(h1.astype(bf16), wseg("w_up"), preferred_element_type=f32)
    up = jax.nn.gelu(up + cseg("b_up"), approximate=True)
    mlp_dim = up.shape[-1]
    dn = jnp.dot(up.astype(bf16), w_64_ref[0:mlp_dim, H:2 * H],
                 preferred_element_type=f32) + cseg("b_dn")
    h2 = h1 + dn

    # ---- lm_head: vocab padded to 128 lanes -> unmasked, lane-dense store ----
    logits = jnp.dot(h2.astype(bf16), wseg("w_lm"),
                     preferred_element_type=f32) + cseg("b_lm")
    logits_ref[...] = logits.astype(logits_ref.dtype)

    # ---- captured intermediates: one lane-dense [BS, 128] slab ---------------
    pieces = [q_rot * sqrt_d, k_rot, attn_out]        # un-scale q for the capture
    pad = inter_ref.shape[-1] - 3 * H
    if pad > 0:
        pieces.append(jnp.zeros((BS, pad), f32))
    inter_ref[...] = jnp.concatenate(pieces, axis=-1).astype(inter_ref.dtype)


def fused_lm_forward(w_H, w_64, consts, *, n_heads, head_dim, vocab, vocab_pad,
                     woff, coff):
    """Single-step fused forward: 3 packed slabs -> (logits [BS,Vp], inter [BS,128])."""
    BS = consts.shape[0]
    H = n_heads * head_dim
    inter_w = max(128, _round_up(3 * H, 128))
    kernel = functools.partial(
        _fused_lm_kernel, n_heads=n_heads, head_dim=head_dim, vocab=vocab,
        woff=woff, coff=coff, sqrt_d=float(head_dim) ** 0.5)
    return pl.pallas_call(
        kernel,
        out_shape=(jax.ShapeDtypeStruct((BS, vocab_pad), jnp.float32),
                   jax.ShapeDtypeStruct((BS, inter_w), jnp.float32)),
        grid=(1,),
        in_specs=[pl.BlockSpec(w_H.shape, lambda i: (0, 0)),
                  pl.BlockSpec(w_64.shape, lambda i: (0, 0)),
                  pl.BlockSpec(consts.shape, lambda i: (0, 0))],
        out_specs=(pl.BlockSpec((BS, vocab_pad), lambda i: (0, 0)),
                   pl.BlockSpec((BS, inter_w), lambda i: (0, 0))),
        compiler_params=pltpu.CompilerParams(vmem_limit_bytes=32 * 1024 * 1024),
    )(w_H, w_64, consts)


# -----------------------------------------------------------------------------
# Tiny synthetic causal LM built on the fused kernel above.
# -----------------------------------------------------------------------------
class TinyCausalLM:
    def __init__(self, key, vocab=64, hidden=32, n_heads=4, seq=8, mlp=64, batch=2):
        assert hidden % n_heads == 0 and (hidden // n_heads) % 2 == 0
        H, F, S, B, V = hidden, mlp, seq, batch, vocab
        D = H // n_heads
        BS = B * S
        Vp = _round_up(V, 128)
        self.config = dict(vocab_size=V, hidden_size=H, num_heads=n_heads,
                           max_seq=S, mlp_dim=F, max_batch=B)
        self.head_dim = D
        self.vocab_pad = Vp

        f32, bf16 = jnp.float32, jnp.bfloat16
        sc = 0.02
        ks = jax.random.split(key, 8)
        wte = sc * jax.random.normal(ks[0], (V, H), f32)
        w_q = sc * jax.random.normal(ks[1], (H, H), f32)
        w_k = sc * jax.random.normal(ks[2], (H, H), f32)
        w_v = sc * jax.random.normal(ks[3], (H, H), f32)
        w_o = sc * jax.random.normal(ks[4], (H, H), f32)
        w_up = sc * jax.random.normal(ks[5], (H, F), f32)
        w_dn = sc * jax.random.normal(ks[6], (F, H), f32)
        w_lm = sc * jax.random.normal(ks[7], (H, V), f32)

        # Signed rotate-half permutation R (per head): rotate_half(x) == x @ R.
        half = D // 2
        r_head = jnp.zeros((D, D), f32)
        r_head = r_head.at[half:, :half].set(-jnp.eye(half, dtype=f32))
        r_head = r_head.at[:half, half:].set(jnp.eye(half, dtype=f32))
        R = jnp.kron(jnp.eye(n_heads, dtype=f32), r_head)          # [H, H]

        # Fold RoPE rotation + 1/sqrt(D) attention scale into the QKV weights.
        scale = 1.0 / float(D) ** 0.5
        w_qkv5 = jnp.concatenate(
            [w_q * scale, (w_q @ R) * scale, w_k, w_k @ R, w_v], axis=1)

        # ---- bf16 weight slab #1: all H-row matrices packed along lanes ------
        self.woff, wW = _layout([("w_qkv", 5 * H), ("w_o", H),
                                 ("w_up", F), ("w_lm", Vp)])
        w_lm_p = jnp.pad(w_lm, ((0, 0), (0, Vp - V)))
        slab = jnp.zeros((H, wW), f32)
        for name, arr in (("w_qkv", w_qkv5), ("w_o", w_o),
                          ("w_up", w_up), ("w_lm", w_lm_p)):
            o, w = self.woff[name]
            slab = slab.at[:, o:o + w].set(arr)
        self.w_H = slab.astype(bf16)

        # ---- bf16 weight slab #2: 64-row matrices (wte | w_dn) ---------------
        rows64 = max(V, F)
        wte_p = jnp.pad(wte, ((0, rows64 - V), (0, 0)))
        wdn_p = jnp.pad(w_dn, ((0, rows64 - F), (0, 0)))
        self.w_64 = jnp.concatenate([wte_p, wdn_p], axis=1).astype(bf16)

        # ---- f32 constants slab: rope tables, causal bias, biases, ids -------
        self.coff, cW = _layout([("cos", H), ("sin", H), ("bias", BS),
                                 ("b_qkv", 5 * H), ("b_o", H), ("b_up", F),
                                 ("b_dn", H), ("b_lm", Vp), ("ids", 1)])
        pos = jnp.arange(S, dtype=f32)[:, None]
        inv = 1.0 / (10000.0 ** (jnp.arange(0, half, dtype=f32) / half))
        ang = pos * inv[None, :]
        ang = jnp.concatenate([ang, ang], axis=-1)                  # [S, D]
        cos = jnp.tile(jnp.cos(ang), (B, n_heads))                  # [B*S, H]
        sin = jnp.tile(jnp.sin(ang), (B, n_heads))

        tok_b = jnp.arange(BS) // S
        tok_p = jnp.arange(BS) % S
        visible = ((tok_b[:, None] == tok_b[None, :]) &
                   (tok_p[None, :] <= tok_p[:, None]))
        bias = jnp.where(visible, 0.0, -1e30).astype(f32)           # [B*S, B*S]

        consts = jnp.zeros((BS, cW), f32)
        for name, arr in (("cos", cos), ("sin", sin), ("bias", bias),
                          ("b_qkv", jnp.zeros((BS, 5 * H), f32)),
                          ("b_o", jnp.zeros((BS, H), f32)),
                          ("b_up", jnp.zeros((BS, F), f32)),
                          ("b_dn", jnp.zeros((BS, H), f32)),
                          ("b_lm", jnp.zeros((BS, Vp), f32))):
            o, w = self.coff[name]
            consts = consts.at[:, o:o + w].set(arr)
        self.const_base = consts            # ids column written per forward call

    def forward(self, input_ids):
        cfg = self.config
        B, S = input_ids.shape
        assert (B, S) == (cfg["max_batch"], cfg["max_seq"])
        H, nH, D = cfg["hidden_size"], cfg["num_heads"], self.head_dim
        V, Vp = cfg["vocab_size"], self.vocab_pad
        BS = B * S

        ids_col = self.coff["ids"][0]
        consts = self.const_base.at[:, ids_col].set(
            input_ids.reshape(BS).astype(jnp.float32))

        logits_flat, inter = fused_lm_forward(
            self.w_H, self.w_64, consts, n_heads=nH, head_dim=D,
            vocab=V, vocab_pad=Vp, woff=self.woff, coff=self.coff)

        logits = logits_flat[:, :V].reshape(B, S, V)

        def to_heads(t):                    # [B*S, H] -> [B*nH, S, D] (XLA glue)
            return (t.reshape(B, S, nH, D).transpose(0, 2, 1, 3)
                     .reshape(B * nH, S, D))

        q_rot = to_heads(inter[:, 0:H])
        k_rot = to_heads(inter[:, H:2 * H])
        attn_out = inter[:, 2 * H:3 * H].reshape(B, S, H)

        intermediates = {
            "rotary_emb_output": (q_rot, k_rot),      # hook on rotary module
            "self_attn_output": attn_out,             # hook on attention module
            "lm_head_output": logits,                 # hook on lm_head
        }
        return logits, intermediates


# -----------------------------------------------------------------------------
# TEMPOModelWrapper equivalent: forwards to the wrapped model and captures the
# intermediate activations that the PyTorch forward-hooks would have captured.
# -----------------------------------------------------------------------------
class TEMPOModelWrapper:
    def __init__(self, model, tokenizer=None, device=None):
        assert model is not None, "Model cannot be None"
        assert hasattr(model, "forward"), "Model must have a forward method"
        assert hasattr(model, "config"), "Model must have a config attribute"
        self.model = model
        self.tokenizer = tokenizer
        self.config = model.config
        self.intermediate_values = {}
        self.debug_mode = False
        # TODO(synk): PyTorch forward-hook registration/removal, device movement
        # and the model.generate passthrough have no Pallas equivalent; the
        # intermediates are captured by value from the fused kernel instead.

    def forward(self, *args, **kwargs):
        self.intermediate_values.clear()
        logits, intermediates = self.model.forward(*args, **kwargs)
        self.intermediate_values.update(intermediates)
        assert logits is not None, "Model forward pass returned None"
        return logits

    __call__ = forward

    def unwrap(self):
        assert self.model is not None, "Model was lost during unwrapping"
        return self.model

    def set_debug_mode(self, enabled=False):
        assert isinstance(enabled, bool), "Debug mode must be a boolean"
        self.debug_mode = enabled


if __name__ == "__main__":
    key = jax.random.PRNGKey(0)
    k_model, k_ids = jax.random.split(key)

    B, S, VOCAB, HIDDEN, HEADS, MLP = 2, 8, 64, 32, 4, 64
    model = TinyCausalLM(k_model, vocab=VOCAB, hidden=HIDDEN, n_heads=HEADS,
                         seq=S, mlp=MLP, batch=B)
    wrapper = TEMPOModelWrapper(model)

    input_ids = jax.random.randint(k_ids, (B, S), 0, VOCAB, dtype=jnp.int32)
    logits = wrapper(input_ids)
    logits = jax.block_until_ready(logits)

    assert logits.shape == (B, S, VOCAB)
    assert "self_attn_output" in wrapper.intermediate_values
    assert "rotary_emb_output" in wrapper.intermediate_values
    assert "lm_head_output" in wrapper.intermediate_values
    q_cap, k_cap = wrapper.intermediate_values["rotary_emb_output"]
    assert q_cap.shape == (B * HEADS, S, HIDDEN // HEADS)
    assert k_cap.shape == (B * HEADS, S, HIDDEN // HEADS)
    assert wrapper.intermediate_values["self_attn_output"].shape == (B, S, HIDDEN)
    assert bool(jnp.all(jnp.isfinite(logits)))
    assert float(jnp.max(jnp.abs(logits))) > 0.0
    print("KERNEL_OK")
</pallas_src>

<mosaic_0001>
module attributes {stable_mosaic.version = 11 : i64} {
  func.func @_fused_lm_kernel(%arg0: i32, %arg1: memref<32x384xbf16, #tpu.memory_space<vmem>>, %arg2: memref<64x64xbf16, #tpu.memory_space<vmem>>, %arg3: memref<16x512xf32, #tpu.memory_space<vmem>>, %arg4: memref<16x128xf32, #tpu.memory_space<vmem>>, %arg5: memref<16x128xf32, #tpu.memory_space<vmem>>) attributes {dimension_semantics = [#tpu.dimension_semantics<arbitrary>], iteration_bounds = array<i64: 1>, scalar_prefetch = 0 : i64, scratch_operands = 0 : i64, tpu.core_type = #tpu.core_type<tc>, window_params = [{pipeline_mode = #tpu.pipeline_mode<synchronous>, transform_indices = @transform_0, window_bounds = array<i64: 32, 384>}, {pipeline_mode = #tpu.pipeline_mode<synchronous>, transform_indices = @transform_1, window_bounds = array<i64: 64, 64>}, {pipeline_mode = #tpu.pipeline_mode<synchronous>, transform_indices = @transform_2, window_bounds = array<i64: 16, 512>}, {pipeline_mode = #tpu.pipeline_mode<synchronous>, transform_indices = @transform_3, window_bounds = array<i64: 16, 128>}, {pipeline_mode = #tpu.pipeline_mode<synchronous>, transform_indices = @transform_4, window_bounds = array<i64: 16, 128>}]} {
    %c0 = arith.constant 0 : index
    %c0_0 = arith.constant 0 : index
    %0 = vector.load %arg3[%c0, %c0_0] : memref<16x512xf32, #tpu.memory_space<vmem>>, vector<16x512xf32>
    %1 = vector.extract_strided_slice %0 {offsets = [0, 496], sizes = [16, 1], strides = [1, 1]} : vector<16x512xf32> to vector<16x1xf32>
    %2 = arith.fptosi %1 : vector<16x1xf32> to vector<16x1xi32>
    %3 = tpu.iota {dimensions = array<i32: 1>} : vector<16x64xi32>
    %4 = vector.broadcast %2 : vector<16x1xi32> to vector<16x64xi32>
    %5 = arith.cmpi eq, %3, %4 : vector<16x64xi32>
    %c0_1 = arith.constant 0 : index
    %c0_2 = arith.constant 0 : index
    %6 = vector.load %arg2[%c0_1, %c0_2] : memref<64x64xbf16, #tpu.memory_space<vmem>>, vector<64x32xbf16>
    %7 = arith.extui %5 : vector<16x64xi1> to vector<16x64xi32>
    %8 = arith.sitofp %7 : vector<16x64xi32> to vector<16x64xf32>
    %9 = arith.truncf %8 : vector<16x64xf32> to vector<16x64xbf16>
    %cst = arith.constant dense<0.000000e+00> : vector<16x32xf32>
    %10 = tpu.matmul %9, %6, %cst {dimension_numbers = #tpu.dot_dimension_numbers<[1], [0], [0], [1], [0, 0, 1, 1], [], []>} : vector<16x64xbf16>, vector<64x32xbf16>, vector<16x32xf32> -> vector<16x32xf32>
    %11 = arith.truncf %10 : vector<16x32xf32> to vector<16x32xbf16>
    %c0_3 = arith.constant 0 : index
    %c0_4 = arith.constant 0 : index
    %12 = vector.load %arg1[%c0_3, %c0_4] : memref<32x384xbf16, #tpu.memory_space<vmem>>, vector<32x160xbf16>
    %cst_5 = arith.constant dense<0.000000e+00> : vector<16x160xf32>
    %13 = tpu.matmul %11, %12, %cst_5 {dimension_numbers = #tpu.dot_dimension_numbers<[1], [0], [0], [1], [0, 0, 1, 1], [], []>} : vector<16x32xbf16>, vector<32x160xbf16>, vector<16x160xf32> -> vector<16x160xf32>
    %14 = vector.extract_strided_slice %0 {offsets = [0, 80], sizes = [16, 160], strides = [1, 1]} : vector<16x512xf32> to vector<16x160xf32>
    %15 = arith.addf %13, %14 : vector<16x160xf32>
    %16 = vector.extract_strided_slice %15 {offsets = [0, 0], sizes = [16, 32], strides = [1, 1]} : vector<16x160xf32> to vector<16x32xf32>
    %17 = vector.extract_strided_slice %15 {offsets = [0, 32], sizes = [16, 32], strides = [1, 1]} : vector<16x160xf32> to vector<16x32xf32>
    %18 = vector.extract_strided_slice %15 {offsets = [0, 64], sizes = [16, 32], strides = [1, 1]} : vector<16x160xf32> to vector<16x32xf32>
    %19 = vector.extract_strided_slice %15 {offsets = [0, 96], sizes = [16, 32], strides = [1, 1]} : vector<16x160xf32> to vector<16x32xf32>
    %20 = vector.extract_strided_slice %15 {offsets = [0, 128], sizes = [16, 32], strides = [1, 1]} : vector<16x160xf32> to vector<16x32xf32>
    %21 = vector.extract_strided_slice %0 {offsets = [0, 0], sizes = [16, 32], strides = [1, 1]} : vector<16x512xf32> to vector<16x32xf32>
    %22 = vector.extract_strided_slice %0 {offsets = [0, 32], sizes = [16, 32], strides = [1, 1]} : vector<16x512xf32> to vector<16x32xf32>
    %23 = arith.mulf %16, %21 : vector<16x32xf32>
    %24 = arith.mulf %17, %22 : vector<16x32xf32>
    %25 = arith.addf %23, %24 : vector<16x32xf32>
    %26 = arith.mulf %18, %21 : vector<16x32xf32>
    %27 = arith.mulf %19, %22 : vector<16x32xf32>
    %28 = arith.addf %26, %27 : vector<16x32xf32>
    %29 = vector.extract_strided_slice %25 {offsets = [0, 0], sizes = [16, 8], strides = [1, 1]} : vector<16x32xf32> to vector<16x8xf32>
    %30 = vector.extract_strided_slice %25 {offsets = [0, 8], sizes = [16, 8], strides = [1, 1]} : vector<16x32xf32> to vector<16x8xf32>
    %31 = vector.extract_strided_slice %25 {offsets = [0, 16], sizes = [16, 8], strides = [1, 1]} : vector<16x32xf32> to vector<16x8xf32>
    %32 = vector.extract_strided_slice %25 {offsets = [0, 24], sizes = [16, 8], strides = [1, 1]} : vector<16x32xf32> to vector<16x8xf32>
    %33 = vector.shape_cast %29 : vector<16x8xf32> to vector<1x16x8xf32>
    %34 = vector.shape_cast %30 : vector<16x8xf32> to vector<1x16x8xf32>
    %35 = vector.shape_cast %31 : vector<16x8xf32> to vector<1x16x8xf32>
    %36 = vector.shape_cast %32 : vector<16x8xf32> to vector<1x16x8xf32>
    %37 = tpu.concatenate %33, %34, %35, %36 in 0 : vector<1x16x8xf32>, vector<1x16x8xf32>, vector<1x16x8xf32>, vector<1x16x8xf32> -> vector<4x16x8xf32>
    %38 = arith.truncf %37 : vector<4x16x8xf32> to vector<4x16x8xbf16>
    %39 = vector.extract_strided_slice %28 {offsets = [0, 0], sizes = [16, 8], strides = [1, 1]} : vector<16x32xf32> to vector<16x8xf32>
    %40 = vector.extract_strided_slice %28 {offsets = [0, 8], sizes = [16, 8], strides = [1, 1]} : vector<16x32xf32> to vector<16x8xf32>
    %41 = vector.extract_strided_slice %28 {offsets = [0, 16], sizes = [16, 8], strides = [1, 1]} : vector<16x32xf32> to vector<16x8xf32>
    %42 = vector.extract_strided_slice %28 {offsets = [0, 24], sizes = [16, 8], strides = [1, 1]} : vector<16x32xf32> to vector<16x8xf32>
    %43 = vector.shape_cast %39 : vector<16x8xf32> to vector<1x16x8xf32>
    %44 = vector.shape_cast %40 : vector<16x8xf32> to vector<1x16x8xf32>
    %45 = vector.shape_cast %41 : vector<16x8xf32> to vector<1x16x8xf32>
    %46 = vector.shape_cast %42 : vector<16x8xf32> to vector<1x16x8xf32>
    %47 = tpu.concatenate %43, %44, %45, %46 in 0 : vector<1x16x8xf32>, vector<1x16x8xf32>, vector<1x16x8xf32>, vector<1x16x8xf32> -> vector<4x16x8xf32>
    %48 = arith.truncf %47 : vector<4x16x8xf32> to vector<4x16x8xbf16>
    %49 = vector.extract_strided_slice %20 {offsets = [0, 0], sizes = [16, 8], strides = [1, 1]} : vector<16x32xf32> to vector<16x8xf32>
    %50 = vector.extract_strided_slice %20 {offsets = [0, 8], sizes = [16, 8], strides = [1, 1]} : vector<16x32xf32> to vector<16x8xf32>
    %51 = vector.extract_strided_slice %20 {offsets = [0, 16], sizes = [16, 8], strides = [1, 1]} : vector<16x32xf32> to vector<16x8xf32>
    %52 = vector.extract_strided_slice %20 {offsets = [0, 24], sizes = [16, 8], strides = [1, 1]} : vector<16x32xf32> to vector<16x8xf32>
    %53 = vector.shape_cast %49 : vector<16x8xf32> to vector<1x16x8xf32>
    %54 = vector.shape_cast %50 : vector<16x8xf32> to vector<1x16x8xf32>
    %55 = vector.shape_cast %51 : vector<16x8xf32> to vector<1x16x8xf32>
    %56 = vector.shape_cast %52 : vector<16x8xf32> to vector<1x16x8xf32>
    %57 = tpu.concatenate %53, %54, %55, %56 in 0 : vector<1x16x8xf32>, vector<1x16x8xf32>, vector<1x16x8xf32>, vector<1x16x8xf32> -> vector<4x16x8xf32>
    %58 = arith.truncf %57 : vector<4x16x8xf32> to vector<4x16x8xbf16>
    "tpu.trace_start"() <{level = 10 : i32, message = "hqd,hkd->hqk"}> : () -> ()
    %cst_6 = arith.constant dense<0.000000e+00> : vector<4x16x16xf32>
    %59 = tpu.matmul %38, %48, %cst_6 {dimension_numbers = #tpu.dot_dimension_numbers<[2], [2], [1], [1], [0, 0, 0, 1, 1, 1], [0], [0]>} : vector<4x16x8xbf16>, vector<4x16x8xbf16>, vector<4x16x16xf32> -> vector<4x16x16xf32>
    "tpu.trace_stop"() : () -> ()
    %60 = vector.extract_strided_slice %0 {offsets = [0, 64], sizes = [16, 16], strides = [1, 1]} : vector<16x512xf32> to vector<16x16xf32>
    %61 = vector.shape_cast %60 : vector<16x16xf32> to vector<1x16x16xf32>
    %62 = vector.broadcast %61 : vector<1x16x16xf32> to vector<4x16x16xf32>
    %63 = arith.addf %59, %62 : vector<4x16x16xf32>
    %cst_7 = arith.constant dense<0xFF800000> : vector<4x16xf32>
    %64 = vector.multi_reduction <maximumf>, %63, %cst_7 [2] : vector<4x16x16xf32> to vector<4x16xf32>
    %65 = vector.shape_cast %64 : vector<4x16xf32> to vector<4x16x1xf32>
    %66 = vector.broadcast %65 : vector<4x16x1xf32> to vector<4x16x16xf32>
    %67 = arith.subf %63, %66 : vector<4x16x16xf32>
    %68 = math.exp %67 : vector<4x16x16xf32>
    %cst_8 = arith.constant dense<0.000000e+00> : vector<4x16xf32>
    %69 = vector.multi_reduction <add>, %68, %cst_8 [2] : vector<4x16x16xf32> to vector<4x16xf32>
    %70 = vector.shape_cast %69 : vector<4x16xf32> to vector<4x16x1xf32>
    %71 = arith.truncf %68 : vector<4x16x16xf32> to vector<4x16x16xbf16>
    "tpu.trace_start"() <{level = 10 : i32, message = "hqk,hkd->hqd"}> : () -> ()
    %cst_9 = arith.constant dense<0.000000e+00> : vector<4x16x8xf32>
    %72 = tpu.matmul %71, %58, %cst_9 {dimension_numbers = #tpu.dot_dimension_numbers<[2], [1], [1], [2], [0, 0, 0, 1, 1, 2], [0], [0]>} : vector<4x16x16xbf16>, vector<4x16x8xbf16>, vector<4x16x8xf32> -> vector<4x16x8xf32>
    "tpu.trace_stop"() : () -> ()
    %73 = tpu.reciprocal %70 {approx = true} : vector<4x16x1xf32> -> vector<4x16x1xf32>
    %74 = vector.broadcast %73 : vector<4x16x1xf32> to vector<4x16x8xf32>
    %75 = arith.mulf %72, %74 : vector<4x16x8xf32>
    %c0_10 = arith.constant 0 : index
    %c160 = arith.constant 160 : index
    %76 = vector.load %arg1[%c0_10, %c160] : memref<32x384xbf16, #tpu.memory_space<vmem>>, vector<32x32xbf16>
    %77 = vector.extract_strided_slice %76 {offsets = [0, 0], sizes = [8, 32], strides = [1, 1]} : vector<32x32xbf16> to vector<8x32xbf16>
    %78 = vector.extract_strided_slice %76 {offsets = [8, 0], sizes = [8, 32], strides = [1, 1]} : vector<32x32xbf16> to vector<8x32xbf16>
    %79 = vector.extract_strided_slice %76 {offsets = [16, 0], sizes = [8, 32], strides = [1, 1]} : vector<32x32xbf16> to vector<8x32xbf16>
    %80 = vector.extract_strided_slice %76 {offsets = [24, 0], sizes = [8, 32], strides = [1, 1]} : vector<32x32xbf16> to vector<8x32xbf16>
    %81 = vector.shape_cast %77 : vector<8x32xbf16> to vector<1x8x32xbf16>
    %82 = vector.shape_cast %78 : vector<8x32xbf16> to vector<1x8x32xbf16>
    %83 = vector.shape_cast %79 : vector<8x32xbf16> to vector<1x8x32xbf16>
    %84 = vector.shape_cast %80 : vector<8x32xbf16> to vector<1x8x32xbf16>
    %85 = tpu.concatenate %81, %82, %83, %84 in 0 : vector<1x8x32xbf16>, vector<1x8x32xbf16>, vector<1x8x32xbf16>, vector<1x8x32xbf16> -> vector<4x8x32xbf16>
    %86 = arith.truncf %75 : vector<4x16x8xf32> to vector<4x16x8xbf16>
    "tpu.trace_start"() <{level = 10 : i32, message = "hqd,hdo->hqo"}> : () -> ()
    %cst_11 = arith.constant dense<0.000000e+00> : vector<4x16x32xf32>
    %87 = tpu.matmul %86, %85, %cst_11 {dimension_numbers = #tpu.dot_dimension_numbers<[2], [1], [1], [2], [0, 0, 0, 1, 1, 2], [0], [0]>} : vector<4x16x8xbf16>, vector<4x8x32xbf16>, vector<4x16x32xf32> -> vector<4x16x32xf32>
    "tpu.trace_stop"() : () -> ()
    %cst_12 = arith.constant dense<0.000000e+00> : vector<16x32xf32>
    %88 = vector.multi_reduction <add>, %87, %cst_12 [0] : vector<4x16x32xf32> to vector<16x32xf32>
    %89 = vector.extract_strided_slice %0 {offsets = [0, 240], sizes = [16, 32], strides = [1, 1]} : vector<16x512xf32> to vector<16x32xf32>
    %90 = arith.addf %88, %89 : vector<16x32xf32>
    %91 = arith.addf %10, %90 : vector<16x32xf32>
    %92 = arith.truncf %91 : vector<16x32xf32> to vector<16x32xbf16>
    %c0_13 = arith.constant 0 : index
    %c192 = arith.constant 192 : index
    %93 = vector.load %arg1[%c0_13, %c192] : memref<32x384xbf16, #tpu.memory_space<vmem>>, vector<32x64xbf16>
    %cst_14 = arith.constant dense<0.000000e+00> : vector<16x64xf32>
    %94 = tpu.matmul %92, %93, %cst_14 {dimension_numbers = #tpu.dot_dimension_numbers<[1], [0], [0], [1], [0, 0, 1, 1], [], []>} : vector<16x32xbf16>, vector<32x64xbf16>, vector<16x64xf32> -> vector<16x64xf32>
    %95 = vector.extract_strided_slice %0 {offsets = [0, 272], sizes = [16, 64], strides = [1, 1]} : vector<16x512xf32> to vector<16x64xf32>
    %96 = arith.addf %94, %95 : vector<16x64xf32>
    %97 = arith.mulf %96, %96 : vector<16x64xf32>
    %98 = arith.mulf %96, %97 : vector<16x64xf32>
    %cst_15 = arith.constant 4.471500e-02 : f32
    %99 = vector.broadcast %cst_15 : f32 to vector<16x64xf32>
    %100 = arith.mulf %99, %98 : vector<16x64xf32>
    %101 = arith.addf %96, %100 : vector<16x64xf32>
    %cst_16 = arith.constant 0.797884583 : f32
    %102 = vector.broadcast %cst_16 : f32 to vector<16x64xf32>
    %103 = arith.mulf %102, %101 : vector<16x64xf32>
    %104 = math.tanh %103 : vector<16x64xf32>
    %cst_17 = arith.constant 1.000000e+00 : f32
    %105 = vector.broadcast %cst_17 : f32 to vector<16x64xf32>
    %106 = arith.addf %105, %104 : vector<16x64xf32>
    %cst_18 = arith.constant 5.000000e-01 : f32
    %107 = vector.broadcast %cst_18 : f32 to vector<16x64xf32>
    %108 = arith.mulf %107, %106 : vector<16x64xf32>
    %109 = arith.mulf %96, %108 : vector<16x64xf32>
    %110 = arith.truncf %109 : vector<16x64xf32> to vector<16x64xbf16>
    %c0_19 = arith.constant 0 : index
    %c32 = arith.constant 32 : index
    %111 = vector.load %arg2[%c0_19, %c32] : memref<64x64xbf16, #tpu.memory_space<vmem>>, vector<64x32xbf16>
    %cst_20 = arith.constant dense<0.000000e+00> : vector<16x32xf32>
    %112 = tpu.matmul %110, %111, %cst_20 {dimension_numbers = #tpu.dot_dimension_numbers<[1], [0], [0], [1], [0, 0, 1, 1], [], []>} : vector<16x64xbf16>, vector<64x32xbf16>, vector<16x32xf32> -> vector<16x32xf32>
    %113 = vector.extract_strided_slice %0 {offsets = [0, 336], sizes = [16, 32], strides = [1, 1]} : vector<16x512xf32> to vector<16x32xf32>
    %114 = arith.addf %112, %113 : vector<16x32xf32>
    %115 = arith.addf %91, %114 : vector<16x32xf32>
    %116 = arith.truncf %115 : vector<16x32xf32> to vector<16x32xbf16>
    %c0_21 = arith.constant 0 : index
    %c256 = arith.constant 256 : index
    %117 = vector.load %arg1[%c0_21, %c256] : memref<32x384xbf16, #tpu.memory_space<vmem>>, vector<32x128xbf16>
    %cst_22 = arith.constant dense<0.000000e+00> : vector<16x128xf32>
    %118 = tpu.matmul %116, %117, %cst_22 {dimension_numbers = #tpu.dot_dimension_numbers<[1], [0], [0], [1], [0, 0, 1, 1], [], []>} : vector<16x32xbf16>, vector<32x128xbf16>, vector<16x128xf32> -> vector<16x128xf32>
    %119 = vector.extract_strided_slice %0 {offsets = [0, 368], sizes = [16, 128], strides = [1, 1]} : vector<16x512xf32> to vector<16x128xf32>
    %120 = arith.addf %118, %119 : vector<16x128xf32>
    %c0_23 = arith.constant 0 : index
    %c0_24 = arith.constant 0 : index
    %121 = vector.load %arg4[%c0_23, %c0_24] : memref<16x128xf32, #tpu.memory_space<vmem>>, vector<16x128xf32>
    tpu.vector_store %arg4[%c0_23, %c0_24], %120 {strides = array<i32>} : memref<16x128xf32, #tpu.memory_space<vmem>>, vector<16x128xf32>,
    %cst_25 = arith.constant 2.82842708 : f32
    %122 = vector.broadcast %cst_25 : f32 to vector<16x32xf32>
    %123 = arith.mulf %25, %122 : vector<16x32xf32>
    %cst_26 = arith.constant 0.000000e+00 : f32
    %124 = vector.broadcast %cst_26 : f32 to vector<16x32xf32>
    %125 = tpu.concatenate %123, %28, %90, %124 in 1 : vector<16x32xf32>, vector<16x32xf32>, vector<16x32xf32>, vector<16x32xf32> -> vector<16x128xf32>
    %c0_27 = arith.constant 0 : index
    %c0_28 = arith.constant 0 : index
    %126 = vector.load %arg5[%c0_27, %c0_28] : memref<16x128xf32, #tpu.memory_space<vmem>>, vector<16x128xf32>
    tpu.vector_store %arg5[%c0_27, %c0_28], %125 {strides = array<i32>} : memref<16x128xf32, #tpu.memory_space<vmem>>, vector<16x128xf32>,
    return
  }
  func.func @transform_0(%arg0: i32) -> (i32, i32) {
    %c0_i32 = arith.constant 0 : i32
    %c0_i32_0 = arith.constant 0 : i32
    %c0_i32_1 = arith.constant 0 : i32
    return %c0_i32, %c0_i32_0 : i32, i32
  }
  func.func @transform_1(%arg0: i32) -> (i32, i32) {
    %c0_i32 = arith.constant 0 : i32
    %c0_i32_0 = arith.constant 0 : i32
    %c0_i32_1 = arith.constant 0 : i32
    return %c0_i32, %c0_i32_0 : i32, i32
  }
  func.func @transform_2(%arg0: i32) -> (i32, i32) {
    %c0_i32 = arith.constant 0 : i32
    %c0_i32_0 = arith.constant 0 : i32
    %c0_i32_1 = arith.constant 0 : i32
    return %c0_i32, %c0_i32_0 : i32, i32
  }
  func.func @transform_3(%arg0: i32) -> (i32, i32) {
    %c0_i32 = arith.constant 0 : i32
    %c0_i32_0 = arith.constant 0 : i32
    %c0_i32_1 = arith.constant 0 : i32
    return %c0_i32, %c0_i32_0 : i32, i32
  }
  func.func @transform_4(%arg0: i32) -> (i32, i32) {
    %c0_i32 = arith.constant 0 : i32
    %c0_i32_0 = arith.constant 0 : i32
    %c0_i32_1 = arith.constant 0 : i32
    return %c0_i32, %c0_i32_0 : i32, i32
  }
}

</mosaic_0001>

<bundles_post_ra>
// kernel: tpu_custom_call.1
= control target key start
LH: loop header
LB: loop body
LE: loop exit
PB: predicated region body
PF: predicated region fallthrough
CT: control target
= control target key end

     0   :  { %10 = vsyncpa [#allocation3], 0  ;;  %s1681_s0 = inlined_call_operand.hbm [shape: bf16[32,384], index: 0, kind: input, shape index: {}]   ;;  %s1682_s1 = inlined_call_operand.hbm [shape: bf16[64,64], index: 1, kind: input, shape index: {}]   ;;  %s1683_s2 = inlined_call_operand.hbm [shape: f32[16,512], index: 2, kind: input, shape index: {}]   ;;  %s1684_s3 = inlined_call_operand.hbm [shape: f32[16,128], index: 3, kind: output, shape index: {0}]   ;;  %s1685_s4 = inlined_call_operand.hbm [shape: f32[16,128], index: 4, kind: output, shape index: {1}]  }
   0x1   :  { %11 = vsyncpa [#allocation6], 0 }
   0x2   :  { %12 = vsyncpa [#allocation4], 0  ;;  %s31_s17 = sshll.u32 %s1682_s1, 4  ;;  %s32_s17 = int_to_ptr.hbm [resolvable:$true] %s31_s17 }
   0x3   :  { %13 = vsyncpa [#allocation10], 0  ;;  %s1412_s18 = smov [#allocation5]   ;;  %s18_s22 = sshll.u32 %s1681_s0, 4  ;;  %s19_s22 = int_to_ptr.hbm [resolvable:$true] %s18_s22 }
   0x4   :  { %s33_s19 = sshll.u32 %s1412_s18, 4  ;;  %s1413_s23 = smov 64   ;;  %s34_s19 = int_to_ptr.vmem [resolvable:$true] %s33_s19 }
   0x5   :  { %s1414_s24 = smov 4   ;;  %s1415_s25 = smov [#allocation2]  }
   0x6   :  { %39 = dma.hbm_to_vmem [thread:$0]  %s32_s17, 512, %s34_s19, [#allocation6], %s1413_s23, %s1413_s23, %s1414_s24  }
   0x7   :  { %s20_s26 = sshll.u32 %s1415_s25, 4  ;;  %s1416_s27 = smov 192   ;;  %s21_s26 = int_to_ptr.vmem [resolvable:$true] %s20_s26 }
   0x8   :  { %s1417_s1 = smov 12   ;;  %s44_s30 = sshll.u32 %s1683_s2, 4  ;;  %s45_s30 = int_to_ptr.hbm [resolvable:$true] %s44_s30 }
   0x9   :  { %26 = dma.hbm_to_vmem [thread:$0]  %s19_s22, 768, %s21_s26, [#allocation3], %s1416_s27, %s1416_s27, %s1417_s1  }
   0xa   :  { %s1418_s5 = smov [#allocation7]   ;;  %s1419_s0 = smov 512  }
   0xb   :  { %s46_s6 = sshll.u32 %s1418_s5, 4  ;;  %s1420_s7 = smov 32   ;;  %s47_s6 = int_to_ptr.vmem [resolvable:$true] %s46_s6 }
   0xc   :  { %52 = dma.hbm_to_vmem [thread:$0]  %s45_s30, 1024, %s47_s6, [#allocation6], %s1419_s0, %s1419_s0, %s1420_s7  }
   0xd   :  { %1404 = dma.done.wait [#allocation3], 768  }
   0xe   :  { %1405 = vsyncadd [#allocation3], 4294966528 }
   0xf   :  { %1406 = dma.done.wait [#allocation6], 1536  }
  0x10   :  { %1407 = vsyncadd [#allocation6], 4294965760  ;;  %v1421_v0 = vmov 112   ;;  %v1469_v1 = vld [vmem:[#allocation7 + $0x18] sm:$0xff]  ;;  %v1157_v12 = vld [vmem:[#allocation5 + $0x10] sm:$0xff]  ;;  %v76_v15 = vlaneseq  ;;  %v1422_v19 = vmov 0.0  }
  0x11   :  { %1202 = vset.pattern.permute.xlu0 %v1421_v0  ;;  %v1471_v2 = vld [vmem:[#allocation7 + $0x38] sm:$0xff]  ;;  %vm1171_vm0 = vcmp.lt.s32.totalorder %v1469_v1, 0  ;;  %v1172_v4 = vceil.f32 %v1469_v1  ;;  %v1173_v5 = vfloor.f32 %v1469_v1  ;;  %v1156_v13 = vld [vmem:[#allocation5 + $0x8] sm:$0xff]  ;;  %v1155_v14 = vld [vmem:[#allocation5] sm:$0xff]  ;;  %vm123_vm4 = vcmask 523264   ;;  %s1423_s2 = smov 48  }
  0x12   :  { %v1158_v3 = vld [vmem:[#allocation5 + $0x18] sm:$0xff]  ;;  %v1177_v7 = vceil.f32 %v1471_v2  ;;  %v1178_v8 = vfloor.f32 %v1471_v2  ;;  %vm1176_vm1 = vcmp.lt.s32.totalorder %v1471_v2, 0  ;;  %v77_v17 = vand.u32 127, %v76_v15  ;;  %v1100_v23 = vld [vmem:[#allocation2 + $0x18] sm:$0xf]  ;;  %v66_v35 = vld [vmem:[#allocation7] sm:$0xff] }
  0x13   :  { %131 = vmatpush.bf16.msra.mxu0 %v1158_v3  ;;  %v1174_v6 = vsel %vm1171_vm0, %v1172_v4, %v1173_v5  ;;  %v1162_v24 = vld [vmem:[#allocation2 + $0x20] sm:$0xf0]  ;;  %v1161_v25 = vld [vmem:[#allocation2 + $0x1c] sm:$0xf]  ;;  %v1102_v27 = vld [vmem:[#allocation2 + $0x24] sm:$0xf0]  ;;  %170 = vrot.lane.b32.xlu1 %v66_v35, %s1423_s2 }
  0x14   :  { %v1175_v9 = vcvt.f32.s32 %v1174_v6  ;;  %v1179_v10 = vsel %vm1176_vm1, %v1177_v7, %v1178_v8  ;;  %v1101_v26 = vor.u32 %v1162_v24, %v1100_v23  ;;  %v1105_v28 = vor.u32 %v1161_v25, %v1102_v27  ;;  %v1092_v29 = vld [vmem:[#allocation2] sm:$0xf]  ;;  %v1160_v30 = vld [vmem:[#allocation2 + $0x8] sm:$0xf0]  ;;  %v1159_v31 = vld [vmem:[#allocation2 + $0x4] sm:$0xf] }
  0x15   :  { %v1180_v11 = vcvt.f32.s32 %v1179_v10  ;;  %v1093_v32 = vor.u32 %v1160_v30, %v1092_v29  ;;  %v1094_v33 = vld [vmem:[#allocation2 + $0xc] sm:$0xf0]  ;;  %v1483_v37 = vld [vmem:[#allocation7 + $0x8] sm:$0xff]  ;;  %vm185_vm5 = vcmask 261120   ;;  %vm178_vm6 = vcmask 392192   ;;  %s1424_s8 = smov 96  }
  0x16   :  { %79 = vperm.xlu0 %1202, %v1175_v9   ;;  %195 = vmatpush.bf16.msra.mxu1 %v1101_v26  ;;  %v1097_v34 = vor.u32 %v1159_v31, %v1094_v33  ;;  %v70_v36 = vld [vmem:[#allocation7 + $0x20] sm:$0xff]  ;;  %v1487_v38 = vld [vmem:[#allocation7 + $0x28] sm:$0xff]  ;;  %s1425_s9 = smov 104   ;;  %s1426_s10 = smov 112   ;;  %vm343_vm7 = vcmask 64512   ;;  %vm460_vm8 = vcmask 130048  }
  0x17   :  { %132 = vmatpush.bf16.msra.mxu0 %v1157_v12  ;;  %209 = vmatpush.bf16.msra.mxu2 %v1105_v28  ;;  %s1427_s11 = smov 120   ;;  %s1428_s12 = smov 16   ;;  %vm694_vm9 = vcmask 1043456   ;;  %vm1028_vm10 = vcmask 785408  }
  0x18   :  { %174 = vrot.lane.b32.xlu2 %v70_v36, %s1423_s2  ;;  %s1429_s13 = smov [#allocation9]   ;;  %s1052_s17 = sshll.u32 %s1685_s4, 4  ;;  %s1053_s17 = int_to_ptr.hbm [resolvable:$true] %s1052_s17 }
  0x19   :  { %s1050_s14 = sshll.u32 %s1429_s13, 4  ;;  %s1430_s18 = smov 128   ;;  %s1051_s14 = int_to_ptr.vmem [resolvable:$true] %s1050_s14 }
  0x1a   :  { %196 = vmatpush.bf16.msra.mxu1 %v1093_v32  ;;  %s1431_s19 = smov 8   ;;  %s1432_s20 = smov [#allocation8]  }
  0x1b   :  { %133 = vmatpush.bf16.msra.mxu0 %v1156_v13  ;;  %210 = vmatpush.bf16.msra.mxu2 %v1097_v34  ;;  %s1037_s21 = sshll.u32 %s1432_s20, 4  ;;  %s1039_s24 = sshll.u32 %s1684_s3, 4  ;;  %s1038_s21 = int_to_ptr.vmem [resolvable:$true] %s1037_s21  ;;  %s1040_s24 = int_to_ptr.hbm [resolvable:$true] %s1039_s24 }
  0x1c   :  { %172 = vrot.lane.b32.xlu1 %v1483_v37, %s1423_s2 }
  0x1e   :  { %82 = vperm.xlu0 %1202, %v1180_v11  }
  0x1f   :  { %134 = vmatpush.bf16.msra.mxu0 %v1155_v14 }
  0x20   :  { %176 = vrot.lane.b32.xlu2 %v1487_v38, %s1423_s2 }
  0x24   :  { %231 = vrot.lane.b32.xlu1 %v70_v36, %s1413_s23 }
  0x26   :  { %229 = vrot.lane.b32.xlu0 %v66_v35, %s1413_s23 }
  0x72   :  { %v175_v43 = vpop.permute.xlu2 %174 }
  0x7a   :  { %v177_v50 = vpop.permute.xlu2 %176 }
  0x7b   :  { %v180_v52 = vsel %vm178_vm6, %v175_v43, %v177_v50 }
  0x85   :  { %v171_v42 = vpop.permute.xlu1 %170 }
  0x88   :  { %v80_v16 = vpop.permute.xlu0 %79 }
  0x89   :  { %vm84_vm2 = vcmp.eq.s32.totalorder %v77_v17, %v80_v16 }
  0x8a   :  { %v1071_v20 = vsel %vm84_vm2, 1.0, %v1422_v19 }
  0x8e   :  { %v173_v44 = vpop.permute.xlu1 %172 }
  0x8f   :  { %v179_v45 = vsel %vm178_vm6, %v171_v42, %v173_v44 }
  0x90   :  { %v83_v18 = vpop.permute.xlu0 %82 }
  0x91   :  { %vm85_vm3 = vcmp.eq.s32.totalorder %v77_v17, %v83_v18 }
  0x92   :  { %v1072_v21 = vsel %vm85_vm3, 1.0, %v1422_v19 }
  0x93   :  { %v98_v22 = vpack.c.bf16 %v1072_v21, %v1071_v20 }
  0x95   :  { %1089 = vmatmul.msk.bf16.vlgmr.msra.gmra.mxu0 %vm123_vm4, %v98_v22 }
  0x96   :  { %v1504_v54 = vpop.permute.xlu1 %231 }
  0x98   :  { %v1500_v47 = vpop.permute.xlu0 %229 }
 0x112   :  { %v1492_v39 = vpop.f32.mrf.mxu0 }
 0x11a   :  { %v1494_v40 = vpop.f32.mrf.mxu0 }
 0x11b   :  { %v141_v41 = vpack.c.bf16 %v1494_v40, %v1492_v39 }
 0x11d   :  { %1106 = vmatmul.msk.bf16.vlgmr.msra.gmra.mxu1 %vm185_vm5, %v141_v41  ;;  %1107 = vmatmul.msk.bf16.vlgmr.msra.gmra.mxu2 %vm185_vm5, %v141_v41 }
 0x19a   :  { %v198_v46 = vpop.f32.mrf.mxu1 }
 0x19b   :  { %v199_v48 = vadd.f32 %v198_v46, %v179_v45 }
 0x19d   :  { %v235_v49 = vmul.f32 %v1500_v47, %v199_v48  ;;  %v217_v63 = vmul.f32 %v199_v48, %v66_v35 }
 0x19f   :  { %239 = vrot.lane.b32.xlu2 %v235_v49, %s1424_s8 }
 0x1a0   :  { %v212_v51 = vpop.f32.mrf.mxu2 }
 0x1a1   :  { %v213_v56 = vadd.f32 %v212_v51, %v173_v44 }
 0x1a2   :  { %v200_v53 = vpop.f32.mrf.mxu1 }
 0x1a3   :  { %v201_v55 = vadd.f32 %v200_v53, %v180_v52  ;;  %v323_v60 = vpack.c.bf16 %v213_v56, %v213_v56 }
 0x1a5   :  { %v236_v57 = vmul.f32 %v1504_v54, %v201_v55  ;;  %v548_v0 = vunpack.c.l.b16 %v323_v60  ;;  %v218_v15 = vmul.f32 %v201_v55, %v70_v36 }
 0x1a7   :  { %241 = vrot.lane.b32.xlu0 %v236_v57, %s1424_s8 }
 0x1a8   :  { %v214_v58 = vpop.f32.mrf.mxu2 }
 0x1a9   :  { %v215_v59 = vadd.f32 %v214_v58, %v177_v50 }
 0x1ab   :  { %v324_v61 = vpack.c.bf16 %v215_v59, %v215_v59  ;;  %v1508_v62 = vpack.i.bf16 %v215_v59, %v213_v56 }
 0x1ad   :  { %v549_v3 = vunpack.c.l.b16 %v324_v61 }
 0x1af   :  { %221 = vrot.lane.b32.xlu0 %v217_v63, %s1424_s8  ;;  %v550_v4 = vpack.c.b16 %v549_v3, %v548_v0 }
 0x1b1   :  { %562 = vmatpush.bf16.msrb.mxu0 %v550_v4 }
 0x1f9   :  { %v240_v5 = vpop.permute.xlu2 %239 }
 0x1fa   :  { %v1511_v6 = vadd.f32 %v240_v5, %v235_v49 }
 0x1fc   :  { %v295_v9 = vpack.c.bf16 %v1511_v6, %v1511_v6 }
 0x1fe   :  { %v338_v12 = vunpack.c.l.b16 %v295_v9 }
 0x219   :  { %v242_v7 = vpop.permute.xlu0 %241 }
 0x21a   :  { %v1513_v8 = vadd.f32 %v242_v7, %v236_v57 }
 0x21c   :  { %v1208_v10 = vpack.i.bf16 %v1513_v8, %v1511_v6  ;;  %v296_v11 = vpack.c.bf16 %v1513_v8, %v1513_v8 }
 0x21e   :  { %1209 = vrot.lane.b32.xlu2 %v1208_v10, %s1425_s9  ;;  %1204 = vrot.lane.b32.xlu1 %v1208_v10, %s1426_s10  ;;  %v339_v13 = vunpack.c.l.b16 %v296_v11 }
 0x220   :  { %v340_v14 = vpack.c.b16 %v339_v13, %v338_v12 }
 0x221   :  { %v222_v24 = vpop.permute.xlu0 %221 }
 0x222   :  { %341 = vrot.lane.b32.xlu0 %v340_v14, %s1413_s23  ;;  %v1527_v32 = vadd.f32 %v222_v24, %v217_v63 }
 0x224   :  { %v267_v45 = vpack.c.bf16 %v1527_v32, %v1527_v32 }
 0x226   :  { %1214 = vrot.lane.b32.xlu2 %v1208_v10, %s1427_s11  ;;  %223 = vrot.lane.b32.xlu1 %v218_v15, %s1424_s8  ;;  %v333_v51 = vunpack.c.l.b16 %v267_v45 }
 0x278   :  { %v1210_v16 = vpop.permute.xlu2 %1209 }
 0x279   :  { %v1212_v17 = vunpack.i.h.bf16 %v1210_v16  ;;  %v1211_v18 = vunpack.i.l.bf16 %v1210_v16 }
 0x27b   :  { %v302_v19 = vpack.c.bf16 %v1212_v17, %v1212_v17  ;;  %v301_v20 = vpack.c.bf16 %v1211_v18, %v1211_v18 }
 0x27d   :  { %v436_v21 = vunpack.c.l.b16 %v302_v19  ;;  %v435_v22 = vunpack.c.l.b16 %v301_v20 }
 0x27f   :  { %v437_v23 = vpack.c.b16 %v436_v21, %v435_v22 }
 0x280   :  { %v1215_v28 = vpop.permute.xlu2 %1214 }
 0x281   :  { %438 = vrot.lane.b32.xlu0 %v437_v23, %s1413_s23  ;;  %v1217_v36 = vunpack.i.h.bf16 %v1215_v28  ;;  %v1216_v41 = vunpack.i.l.bf16 %v1215_v28 }
 0x283   :  { %v298_v46 = vpack.c.bf16 %v1217_v36, %v1217_v36  ;;  %v297_v48 = vpack.c.bf16 %v1216_v41, %v1216_v41 }
 0x285   :  { %v372_v53 = vunpack.c.l.b16 %v298_v46  ;;  %v371_v55 = vunpack.c.l.b16 %v297_v48 }
 0x287   :  { %v373_v57 = vpack.c.b16 %v372_v53, %v371_v55 }
 0x290   :  { %v1205_v25 = vpop.permute.xlu1 %1204 }
 0x291   :  { %v1207_v26 = vunpack.i.h.bf16 %v1205_v25  ;;  %v1206_v27 = vunpack.i.l.bf16 %v1205_v25 }
 0x293   :  { %v300_v29 = vpack.c.bf16 %v1207_v26, %v1207_v26  ;;  %v299_v30 = vpack.c.bf16 %v1206_v27, %v1206_v27 }
 0x294   :  { %v342_v31 = vpop.permute.xlu0 %341 }
 0x295   :  { %v404_v33 = vunpack.c.l.b16 %v300_v29  ;;  %v403_v34 = vunpack.c.l.b16 %v299_v30  ;;  %v348_v35 = vsel %vm343_vm7, %v342_v31, 0 }
 0x296   :  { %357 = vmatpush.bf16.xpose.msra.mxu3 %v348_v35 }
 0x297   :  { %v405_v42 = vpack.c.b16 %v404_v33, %v403_v34 }
 0x298   :  { %v224_v43 = vpop.permute.xlu1 %223 }
 0x299   :  { %v1530_v44 = vadd.f32 %v224_v43, %v218_v15  ;;  %406 = vrot.lane.b32.xlu1 %v405_v42, %s1413_s23 }
 0x29b   :  { %v1228_v49 = vpack.i.bf16 %v1530_v44, %v1527_v32  ;;  %v268_v50 = vpack.c.bf16 %v1530_v44, %v1530_v44 }
 0x29d   :  { %1229 = vrot.lane.b32.xlu0 %v1228_v49, %s1427_s11  ;;  %1219 = vrot.lane.b32.xlu2 %v1228_v49, %s1426_s10  ;;  %v334_v52 = vunpack.c.l.b16 %v268_v50 }
 0x29f   :  { %v335_v56 = vpack.c.b16 %v334_v52, %v333_v51 }
 0x2a1   :  { %1224 = vrot.lane.b32.xlu1 %v1228_v49, %s1425_s9  ;;  %1108 = vmatmul.msk.bf16.vlgmr.msra.gmra.mxu3 %vm343_vm7, %v335_v56 }
 0x2a5   :  { %374 = vrot.lane.b32.xlu2 %v373_v57, %s1413_s23 }
 0x2f3   :  { %v439_v58 = vpop.permute.xlu0 %438 }
 0x2f4   :  { %v444_v59 = vsel %vm343_vm7, %v439_v58, 0 }
 0x2f5   :  { %453 = vmatpush.bf16.xpose.msrb.mxu3 %v444_v59 }
 0x2f7   :  { %v1220_v60 = vpop.permute.xlu2 %1219 }
 0x2f8   :  { %v1222_v0 = vunpack.i.h.bf16 %v1220_v60  ;;  %v1221_v3 = vunpack.i.l.bf16 %v1220_v60 }
 0x2fa   :  { %v272_v4 = vpack.c.bf16 %v1222_v0, %v1222_v0  ;;  %v271_v5 = vpack.c.bf16 %v1221_v3, %v1221_v3 }
 0x2fc   :  { %v399_v10 = vunpack.c.l.b16 %v272_v4  ;;  %v398_v11 = vunpack.c.l.b16 %v271_v5 }
 0x2fe   :  { %v400_v15 = vpack.c.b16 %v399_v10, %v398_v11 }
 0x2ff   :  { %v375_v61 = vpop.permute.xlu2 %374 }
 0x300   :  { %v380_v63 = vsel %vm343_vm7, %v375_v61, 0 }
 0x301   :  { %389 = vmatpush.bf16.xpose.msrb.mxu1 %v380_v63 }
 0x30b   :  { %v407_v7 = vpop.permute.xlu1 %406 }
 0x30c   :  { %v412_v9 = vsel %vm343_vm7, %v407_v7, 0 }
 0x30d   :  { %421 = vmatpush.bf16.xpose.msrb.mxu2 %v412_v9 }
 0x30f   :  { %v1230_v12 = vpop.permute.xlu0 %1229 }
 0x310   :  { %v1232_v13 = vunpack.i.h.bf16 %v1230_v12  ;;  %v1231_v14 = vunpack.i.l.bf16 %v1230_v12 }
 0x312   :  { %v270_v16 = vpack.c.bf16 %v1232_v13, %v1232_v13  ;;  %v269_v17 = vpack.c.bf16 %v1231_v14, %v1231_v14 }
 0x313   :  { %v1225_v18 = vpop.permute.xlu1 %1224 }
 0x314   :  { %v367_v19 = vunpack.c.l.b16 %v270_v16  ;;  %v366_v20 = vunpack.c.l.b16 %v269_v17  ;;  %v1227_v21 = vunpack.i.h.bf16 %v1225_v18  ;;  %v1226_v22 = vunpack.i.l.bf16 %v1225_v18  ;;  %1110 = vmatmul.msk.bf16.vlgmr.msrb.gmra.mxu2 %vm343_vm7, %v400_v15 }
 0x316   :  { %v368_v23 = vpack.c.b16 %v367_v19, %v366_v20  ;;  %v274_v24 = vpack.c.bf16 %v1227_v21, %v1227_v21  ;;  %v273_v25 = vpack.c.bf16 %v1226_v22, %v1226_v22 }
 0x318   :  { %v431_v26 = vunpack.c.l.b16 %v274_v24  ;;  %v430_v27 = vunpack.c.l.b16 %v273_v25  ;;  %1109 = vmatmul.msk.bf16.vlgmr.msrb.gmra.mxu1 %vm343_vm7, %v368_v23 }
 0x31a   :  { %v432_v28 = vpack.c.b16 %v431_v26, %v430_v27 }
 0x31c   :  { %1111 = vmatmul.msk.bf16.vlgmr.msrb.gmra.mxu3 %vm343_vm7, %v432_v28 }
 0x324   :  { %v359_v29 = vpop.f32.mrf.mxu3 }
 0x325   :  { %v360_v30 = vadd.f32 %v359_v29, %v1500_v47 }
 0x327   :  { %v461_v31 = vsel %vm460_vm8, %v360_v30, -inf }
 0x328   :  { %462 = vmax.xlane.f32.xlu2 %v461_v31 }
 0x32c   :  { %v361_v33 = vpop.f32.mrf.mxu3 }
 0x32d   :  { %v362_v34 = vadd.f32 %v361_v33, %v1504_v54 }
 0x32f   :  { %v464_v35 = vsel %vm460_vm8, %v362_v34, -inf }
 0x330   :  { %465 = vmax.xlane.f32.xlu0 %v464_v35 }
 0x395   :  { %v391_v36 = vpop.f32.mrf.mxu1 }
 0x396   :  { %v392_v41 = vadd.f32 %v391_v36, %v1500_v47 }
 0x397   :  { %v423_v42 = vpop.f32.mrf.mxu2 }
 0x398   :  { %v424_v43 = vadd.f32 %v423_v42, %v1500_v47  ;;  %v467_v45 = vsel %vm460_vm8, %v392_v41, -inf }
 0x399   :  { %468 = vmax.xlane.f32.xlu2 %v467_v45 }
 0x39a   :  { %v473_v46 = vsel %vm460_vm8, %v424_v43, -inf }
 0x39b   :  { %474 = vmax.xlane.f32.xlu1 %v473_v46  ;;  %v463_v48 = vpop.xlane.xlu2 %462 }
 0x39c   :  { %v485_v49 = vsub.f32 %v360_v30, %v463_v48 }
 0x39d   :  { %v393_v58 = vpop.f32.mrf.mxu1 }
 0x39e   :  { %v493_v52 = vmul.f32 1.442695, %v485_v49  ;;  %v394_v61 = vadd.f32 %v393_v58, %v1504_v54 }
 0x39f   :  { %v425_v50 = vpop.f32.mrf.mxu2  ;;  %v455_v51 = vpop.f32.mrf.mxu3 }
 0x3a0   :  { %v426_v53 = vadd.f32 %v425_v50, %v1504_v54  ;;  %v456_v55 = vadd.f32 %v455_v51, %v1500_v47  ;;  %1248 = vpow2.f32 %v493_v52  ;;  %v470_v47 = vsel %vm460_vm8, %v394_v61, -inf }
 0x3a2   :  { %v479_v56 = vsel %vm460_vm8, %v456_v55, -inf  ;;  %v476_v57 = vsel %vm460_vm8, %v426_v53, -inf }
 0x3a3   :  { %480 = vmax.xlane.f32.xlu0 %v479_v56  ;;  %v466_v59 = vpop.xlane.xlu0 %465  ;;  %477 = vmax.xlane.f32.xlu2 %v476_v57 }
 0x3a4   :  { %v486_v60 = vsub.f32 %v362_v34, %v466_v59 }
 0x3a6   :  { %v495_v63 = vmul.f32 1.442695, %v486_v60  ;;  %v1249_v4 = vpop.eup %1248 }
 0x3a7   :  { %v457_v0 = vpop.f32.mrf.mxu3  ;;  %v533_v7 = vpack.c.bf16 %v1249_v4, %v1249_v4 }
 0x3a8   :  { %1250 = vpow2.f32 %v495_v63  ;;  %v458_v3 = vadd.f32 %v457_v0, %v1504_v54  ;;  %v509_v54 = vsel %vm460_vm8, %v1249_v4, 0.0 }
 0x3a9   :  { %v543_v11 = vunpack.c.l.b16 %v533_v7 }
 0x3aa   :  { %v482_v5 = vsel %vm460_vm8, %v458_v3, -inf }
 0x3ab   :  { %471 = vmax.xlane.f32.xlu0 %v470_v47  ;;  %483 = vmax.xlane.f32.xlu2 %v482_v5 }
 0x3ae   :  { %v1251_v9 = vpop.eup %1250 }
 0x3af   :  { %v534_v10 = vpack.c.bf16 %v1251_v9, %v1251_v9  ;;  %v512_v14 = vsel %vm460_vm8, %v1251_v9, 0.0 }
 0x3b1   :  { %v544_v12 = vunpack.c.l.b16 %v534_v10 }
 0x3b3   :  { %v545_v13 = vpack.c.b16 %v544_v12, %v543_v11 }
 0x3b4   :  { %1234 = vrot.lane.b32.xlu1 %v1508_v62, %s1426_s10 }
 0x3b5   :  { %1112 = vmatmul.msk.bf16.vlgmr.msrb.gmra.mxu0 %vm460_vm8, %v545_v13  ;;  %v672_v13 = vld [vmem:[#allocation2 + $0x28] sm:$0xf] }
 0x3bf   :  { %1244 = vrot.lane.b32.xlu0 %v1508_v62, %s1427_s11 }
 0x3c3   :  { %1239 = vrot.lane.b32.xlu2 %v1508_v62, %s1425_s9 }
 0x3de   :  { %510 = vadd.xlane.f32.xlu1 %v509_v54 }
 0x3e6   :  { %513 = vadd.xlane.f32.xlu1 %v512_v14 }
 0x40c   :  { %v469_v15 = vpop.xlane.xlu2 %468 }
 0x40d   :  { %v487_v16 = vsub.f32 %v392_v41, %v469_v15 }
 0x40e   :  { %v475_v17 = vpop.xlane.xlu1 %474 }
 0x40f   :  { %v497_v18 = vmul.f32 1.442695, %v487_v16  ;;  %v489_v19 = vsub.f32 %v424_v43, %v475_v17  ;;  %v778_v17 = vunpack.c.l.b16 %v672_v13 }
 0x411   :  { %1252 = vpow2.f32 %v497_v18  ;;  %v501_v20 = vmul.f32 1.442695, %v489_v19 }
 0x413   :  { %1254 = vpow2.f32 %v501_v20 }
 0x416   :  { %v481_v21 = vpop.xlane.xlu0 %480  ;;  %v478_v22 = vpop.xlane.xlu2 %477 }
 0x417   :  { %v1575_v23 = vpop.eup %1252  ;;  %v491_v24 = vsub.f32 %v456_v55, %v481_v21  ;;  %v490_v62 = vsub.f32 %v426_v53, %v478_v22 }
 0x418   :  { %v515_v25 = vsel %vm460_vm8, %v1575_v23, 0.0 }
 0x419   :  { %v1255_v26 = vpop.eup %1254  ;;  %v505_v27 = vmul.f32 1.442695, %v491_v24  ;;  %v503_v28 = vmul.f32 1.442695, %v490_v62  ;;  %516 = vadd.xlane.f32.xlu0 %v515_v25  ;;  %v779_v25 = vpack.c.b16 %v778_v17, %v778_v17 }
 0x41a   :  { %v521_v29 = vsel %vm460_vm8, %v1255_v26, 0.0  ;;  %v537_v60 = vpack.c.bf16 %v1255_v26, %v1255_v26  ;;  %v535_v26 = vpack.c.bf16 %v1575_v23, %v1575_v23 }
 0x41b   :  { %1256 = vpow2.f32 %v505_v27  ;;  %522 = vadd.xlane.f32.xlu1 %v521_v29  ;;  %v670_v27 = vld [vmem:[#allocation2 + $0x10] sm:$0xf] }
 0x41c   :  { %1258 = vpow2.f32 %v503_v28  ;;  %v599_v54 = vunpack.c.l.b16 %v537_v60 }
 0x41e   :  { %v472_v30 = vpop.xlane.xlu0 %471  ;;  %v484_v31 = vpop.xlane.xlu2 %483 }
 0x41f   :  { %v488_v33 = vsub.f32 %v394_v61, %v472_v30  ;;  %v492_v34 = vsub.f32 %v458_v3, %v484_v31 }
 0x421   :  { %v1257_v35 = vpop.eup %1256  ;;  %v499_v36 = vmul.f32 1.442695, %v488_v33  ;;  %v507_v41 = vmul.f32 1.442695, %v492_v34  ;;  %v718_v33 = vunpack.c.l.b16 %v670_v27  ;;  %v669_v34 = vld [vmem:[#allocation2 + $0x4] sm:$0xf] }
 0x422   :  { %v1259_v42 = vpop.eup %1258  ;;  %v527_v43 = vsel %vm460_vm8, %v1257_v35, 0.0  ;;  %v539_v61 = vpack.c.bf16 %v1257_v35, %v1257_v35  ;;  %v571_v35 = vunpack.c.l.b16 %v535_v26 }
 0x423   :  { %1260 = vpow2.f32 %v499_v36  ;;  %528 = vadd.xlane.f32.xlu2 %v527_v43  ;;  %v524_v45 = vsel %vm460_vm8, %v1259_v42, 0.0  ;;  %v538_v52 = vpack.c.bf16 %v1259_v42, %v1259_v42  ;;  %v671_v42 = vld [vmem:[#allocation2 + $0x1c] sm:$0xf]  ;;  %v719_v43 = vpack.c.b16 %v718_v33, %v718_v33 }
 0x424   :  { %1262 = vpow2.f32 %v507_v41  ;;  %525 = vadd.xlane.f32.xlu0 %v524_v45  ;;  %v627_v15 = vunpack.c.l.b16 %v539_v61  ;;  %v687_v41 = vunpack.c.l.b16 %v669_v34  ;;  %v748_v45 = vunpack.c.l.b16 %v671_v42 }
 0x425   :  { %v600_v7 = vunpack.c.l.b16 %v538_v52  ;;  %v1126_v52 = vld [vmem:[#allocation2 + $0x1c] sm:$0xf] }
 0x426   :  { %v1235_v46 = vpop.permute.xlu1 %1234  ;;  %v1240_v48 = vpop.permute.xlu2 %1239  ;;  %v749_v23 = vpack.c.b16 %v748_v45, %v748_v45 }
 0x427   :  { %v1237_v49 = vunpack.i.h.bf16 %v1235_v46  ;;  %v1236_v50 = vunpack.i.l.bf16 %v1235_v46  ;;  %v1242_v51 = vunpack.i.h.bf16 %v1240_v48  ;;  %v1241_v53 = vunpack.i.l.bf16 %v1240_v48  ;;  %v1595_v48 = vld [vmem:[#allocation7 + $0x10] sm:$0xff] }
 0x428   :  { %v601_v16 = vpack.c.b16 %v600_v7, %v599_v54  ;;  %v688_v46 = vpack.c.b16 %v687_v41, %v687_v41 }
 0x429   :  { %v1261_v55 = vpop.eup %1260  ;;  %v328_v56 = vpack.c.bf16 %v1237_v49, %v1237_v49  ;;  %v327_v57 = vpack.c.bf16 %v1236_v50, %v1236_v50  ;;  %v330_v58 = vpack.c.bf16 %v1242_v51, %v1242_v51  ;;  %v329_v63 = vpack.c.bf16 %v1241_v53, %v1241_v53  ;;  %v1122_v49 = vld [vmem:[#allocation2 + $0x4] sm:$0xf]  ;;  %v1163_v50 = vld [vmem:[#allocation2 + $0xc] sm:$0xf0]  ;;  %v1164_v53 = vld [vmem:[#allocation2 + $0x24] sm:$0xf0] }
 0x42a   :  { %v1263_v59 = vpop.eup %1262  ;;  %v518_v0 = vsel %vm460_vm8, %v1261_v55, 0.0  ;;  %v536_v22 = vpack.c.bf16 %v1261_v55, %v1261_v55  ;;  %v1123_v51 = vor.u32 %v1163_v50, %v1122_v49  ;;  %v1127_v55 = vor.u32 %v1164_v53, %v1126_v52 }
 0x42b   :  { %v540_v3 = vpack.c.bf16 %v1263_v59, %v1263_v59  ;;  %v605_v4 = vunpack.c.l.b16 %v328_v56  ;;  %v604_v47 = vunpack.c.l.b16 %v327_v57  ;;  %v633_v5 = vunpack.c.l.b16 %v330_v58  ;;  %519 = vadd.xlane.f32.xlu2 %v518_v0  ;;  %v1168_v56 = vld [vmem:[#allocation5 + $0x18] sm:$0xff]  ;;  %v1165_v57 = vld [vmem:[#allocation5] sm:$0xff]  ;;  %v1166_v58 = vld [vmem:[#allocation5 + $0x8] sm:$0xff] }
 0x42c   :  { %v632_v9 = vunpack.c.l.b16 %v329_v63  ;;  %v530_v10 = vsel %vm460_vm8, %v1263_v59, 0.0  ;;  %v572_v30 = vunpack.c.l.b16 %v536_v22 }
 0x42d   :  { %v628_v11 = vunpack.c.l.b16 %v540_v3  ;;  %v606_v12 = vpack.c.b16 %v605_v4, %v604_v47  ;;  %531 = vadd.xlane.f32.xlu1 %v530_v10 }
 0x42e   :  { %v634_v14 = vpack.c.b16 %v633_v5, %v632_v9  ;;  %v573_v36 = vpack.c.b16 %v572_v30, %v571_v35 }
 0x42f   :  { %618 = vmatpush.bf16.msra.mxu2 %v606_v12  ;;  %v629_v18 = vpack.c.b16 %v628_v11, %v627_v15 }
 0x430   :  { %646 = vmatpush.bf16.msra.mxu3 %v634_v14 }
 0x431   :  { %v1245_v19 = vpop.permute.xlu0 %1244 }
 0x432   :  { %v1247_v20 = vunpack.i.h.bf16 %v1245_v19  ;;  %v1246_v21 = vunpack.i.l.bf16 %v1245_v19  ;;  %1114 = vmatmul.msk.bf16.vlgmr.msra.gmra.mxu2 %vm460_vm8, %v601_v16  ;;  %v564_v60 = vpop.f32.mrf.mxu0 }
 0x433   :  { %1115 = vmatmul.msk.bf16.vlgmr.msra.gmra.mxu3 %vm460_vm8, %v629_v18 }
 0x434   :  { %v326_v24 = vpack.c.bf16 %v1247_v20, %v1247_v20  ;;  %v325_v62 = vpack.c.bf16 %v1246_v21, %v1246_v21  ;;  %v1167_v20 = vld [vmem:[#allocation5 + $0x10] sm:$0xff] }
 0x436   :  { %v577_v28 = vunpack.c.l.b16 %v326_v24  ;;  %v576_v29 = vunpack.c.l.b16 %v325_v62 }
 0x438   :  { %v578_v31 = vpack.c.b16 %v577_v28, %v576_v29  ;;  %780 = vrot.lane.b32.xlu0 %v779_v25, %s1424_s8 }
 0x43a   :  { %590 = vmatpush.bf16.msra.mxu1 %v578_v31  ;;  %v566_v4 = vpop.f32.mrf.mxu0 }
 0x43d   :  { %1113 = vmatmul.msk.bf16.vlgmr.msra.gmra.mxu1 %vm460_vm8, %v573_v36 }
 0x440   :  { %720 = vrot.lane.b32.xlu0 %v719_v43, %s1424_s8 }
 0x443   :  { %689 = vrot.lane.b32.xlu2 %v688_v46, %s1424_s8 }
 0x446   :  { %750 = vrot.lane.b32.xlu1 %v749_v23, %s1424_s8 }
 0x448   :  { %822 = vrot.lane.b32.xlu0 %v1487_v38, %s1428_s12  ;;  %v72_v38 = vld [vmem:[#allocation7 + $0x30] sm:$0xff] }
 0x44b   :  { %820 = vrot.lane.b32.xlu2 %v1595_v48, %s1428_s12 }
 0x44e   :  { %818 = vrot.lane.b32.xlu1 %v1483_v37, %s1428_s12 }
 0x450   :  { %849 = vrot.lane.b32.xlu0 %v1123_v51, %s1413_s23 }
 0x451   :  { %v511_v37 = vpop.xlane.xlu1 %510 }
 0x453   :  { %851 = vrot.lane.b32.xlu2 %v1127_v55, %s1413_s23 }
 0x456   :  { %824 = vrot.lane.b32.xlu1 %v72_v38, %s1428_s12 }
 0x458   :  { %931 = vrot.lane.b32.xlu0 %v1168_v56, %s1424_s8 }
 0x459   :  { %v514_v59 = vpop.xlane.xlu1 %513 }
 0x45a   :  { %1264 = vrcp.f32 %v514_v59 }
 0x45b   :  { %857 = vrot.lane.b32.xlu2 %v72_v38, %s1426_s10  ;;  %1266 = vrcp.f32 %v511_v37 }
 0x45e   :  { %855 = vrot.lane.b32.xlu1 %v1595_v48, %s1426_s10 }
 0x460   :  { %925 = vrot.lane.b32.xlu0 %v1165_v57, %s1424_s8  ;;  %v1265_v63 = vpop.eup %1264 }
 0x461   :  { %v1267_v3 = vpop.eup %1266  ;;  %v662_v47 = vmul.f32 %v1265_v63, %v566_v4 }
 0x462   :  { %v661_v5 = vmul.f32 %v1267_v3, %v564_v60 }
 0x463   :  { %927 = vrot.lane.b32.xlu2 %v1166_v58, %s1424_s8  ;;  %v674_v7 = vpack.c.bf16 %v662_v47, %v662_v47 }
 0x464   :  { %v673_v10 = vpack.c.bf16 %v661_v5, %v661_v5 }
 0x466   :  { %929 = vrot.lane.b32.xlu1 %v1167_v20, %s1424_s8 }
 0x468   :  { %981 = vrot.lane.b32.xlu0 %v1469_v1, %s1428_s12 }
 0x46b   :  { %939 = vrot.lane.b32.xlu2 %v72_v38, %s1423_s2 }
 0x46e   :  { %937 = vrot.lane.b32.xlu1 %v1595_v48, %s1423_s2 }
 0x470   :  { %1012 = vrot.lane.b32.xlu0 %v1513_v8, %s1424_s8  ;;  %v684_v8 = vunpack.c.l.b16 %v674_v7 }
 0x473   :  { %1010 = vrot.lane.b32.xlu2 %v1511_v6, %s1424_s8  ;;  %v683_v6 = vunpack.c.l.b16 %v673_v10 }
 0x475   :  { %v685_v54 = vpack.c.b16 %v684_v8, %v683_v6 }
 0x476   :  { %983 = vrot.lane.b32.xlu1 %v1471_v2, %s1428_s12 }
 0x48c   :  { %v517_v0 = vpop.xlane.xlu0 %516 }
 0x48e   :  { %v523_v13 = vpop.xlane.xlu1 %522 }
 0x48f   :  { %1268 = vrcp.f32 %v523_v13 }
 0x495   :  { %v1269_v25 = vpop.eup %1268 }
 0x496   :  { %v529_v61 = vpop.xlane.xlu2 %528 }
 0x497   :  { %v526_v9 = vpop.xlane.xlu0 %525  ;;  %1270 = vrcp.f32 %v529_v61 }
 0x498   :  { %1272 = vrcp.f32 %v517_v0 }
 0x499   :  { %1274 = vrcp.f32 %v526_v9 }
 0x49d   :  { %v1271_v27 = vpop.eup %1270 }
 0x49e   :  { %v520_v1 = vpop.xlane.xlu2 %519  ;;  %v1273_v33 = vpop.eup %1272 }
 0x49f   :  { %v1275_v34 = vpop.eup %1274 }
 0x4a0   :  { %v532_v17 = vpop.xlane.xlu1 %531 }
 0x4a1   :  { %1276 = vrcp.f32 %v532_v17 }
 0x4a2   :  { %1278 = vrcp.f32 %v520_v1 }
 0x4a6   :  { %v690_v11 = vpop.permute.xlu2 %689 }
 0x4a7   :  { %v696_v12 = vsel %vm694_vm9, %v690_v11, 0  ;;  %v1277_v36 = vpop.eup %1276 }
 0x4a8   :  { %705 = vmatpush.bf16.msra.mxu0 %v696_v12  ;;  %v1279_v51 = vpop.eup %1278 }
 0x4aa   :  { %v781_v14 = vpop.permute.xlu0 %780 }
 0x4ab   :  { %v786_v15 = vsel %vm694_vm9, %v781_v14, 0  ;;  %1116 = vmatmul.msk.bf16.vlgmr.msra.gmra.mxu0 %vm343_vm7, %v685_v54 }
 0x4ac   :  { %795 = vmatpush.bf16.msrb.mxu3 %v786_v15 }
 0x4ae   :  { %v1620_v16 = vpop.permute.xlu2 %820 }
 0x4b2   :  { %v721_v18 = vpop.permute.xlu0 %720 }
 0x4b3   :  { %v726_v19 = vsel %vm694_vm9, %v721_v18, 0 }
 0x4b4   :  { %735 = vmatpush.bf16.msrb.mxu1 %v726_v19 }
 0x4b5   :  { %v620_v21 = vpop.f32.mrf.mxu2 }
 0x4b6   :  { %v648_v22 = vpop.f32.mrf.mxu3  ;;  %v852_v24 = vpop.permute.xlu2 %851  ;;  %v665_v28 = vmul.f32 %v1269_v25, %v620_v21 }
 0x4b7   :  { %870 = vmatpush.bf16.msrb.mxu0 %v852_v24  ;;  %v667_v31 = vmul.f32 %v1271_v27, %v648_v22 }
 0x4b8   :  { %v751_v62 = vpop.permute.xlu1 %750  ;;  %v677_v41 = vpack.c.bf16 %v665_v28, %v665_v28 }
 0x4b9   :  { %v756_v26 = vsel %vm694_vm9, %v751_v62, 0  ;;  %v679_v45 = vpack.c.bf16 %v667_v31, %v667_v31 }
 0x4ba   :  { %v1625_v29 = vpop.permute.xlu0 %822  ;;  %v592_v30 = vpop.f32.mrf.mxu1  ;;  %765 = vmatpush.bf16.msrb.mxu2 %v756_v26  ;;  %v744_v52 = vunpack.c.l.b16 %v677_v41 }
 0x4bb   :  { %v663_v46 = vmul.f32 %v1273_v33, %v592_v30  ;;  %v774_v38 = vunpack.c.l.b16 %v679_v45 }
 0x4bd   :  { %v622_v35 = vpop.f32.mrf.mxu2  ;;  %v675_v57 = vpack.c.bf16 %v663_v46, %v663_v46 }
 0x4be   :  { %v666_v42 = vmul.f32 %v1275_v34, %v622_v35  ;;  %v650_v43 = vpop.f32.mrf.mxu3  ;;  %v1636_v5 = vpop.permute.xlu2 %857 }
 0x4bf   :  { %v668_v23 = vmul.f32 %v1277_v36, %v650_v43  ;;  %v714_v48 = vunpack.c.l.b16 %v675_v57 }
 0x4c0   :  { %v678_v49 = vpack.c.bf16 %v666_v42, %v666_v42  ;;  %v819_v4 = vpop.permute.xlu1 %818 }
 0x4c1   :  { %v680_v50 = vpack.c.bf16 %v668_v23, %v668_v23  ;;  %v826_v17 = vsel %vm460_vm8, %v819_v4, %v1620_v16 }
 0x4c2   :  { %v745_v53 = vunpack.c.l.b16 %v678_v49  ;;  %v850_v55 = vpop.permute.xlu0 %849  ;;  %v594_v56 = vpop.f32.mrf.mxu1  ;;  %v1009_v49 = vmul.f32 2.828427, %v1530_v44 }
 0x4c3   :  { %v775_v58 = vunpack.c.l.b16 %v680_v50  ;;  %v664_v37 = vmul.f32 %v1279_v51, %v594_v56  ;;  %871 = vmatpush.bf16.msrb.mxu0 %v850_v55 }
 0x4c4   :  { %v746_v59 = vpack.c.b16 %v745_v53, %v744_v52  ;;  %v1008_v53 = vmul.f32 2.828427, %v1527_v32 }
 0x4c5   :  { %v776_v60 = vpack.c.b16 %v775_v58, %v774_v38  ;;  %v676_v61 = vpack.c.bf16 %v664_v37, %v664_v37 }
 0x4c6   :  { %1118 = vmatmul.msk.bf16.vlgmr.msrb.gmra.mxu2 %vm343_vm7, %v746_v59  ;;  %v928_v9 = vpop.permute.xlu2 %927 }
 0x4c7   :  { %v715_v63 = vunpack.c.l.b16 %v676_v61  ;;  %1119 = vmatmul.msk.bf16.vlgmr.msrb.gmra.mxu3 %vm343_vm7, %v776_v60 }
 0x4c8   :  { %v1634_v47 = vpop.permute.xlu1 %824 }
 0x4c9   :  { %v716_v0 = vpack.c.b16 %v715_v63, %v714_v48  ;;  %v827_v34 = vsel %vm460_vm8, %v1625_v29, %v1634_v47 }
 0x4ca   :  { %v932_v3 = vpop.permute.xlu0 %931 }
 0x4cb   :  { %1117 = vmatmul.msk.bf16.vlgmr.msrb.gmra.mxu1 %vm343_vm7, %v716_v0 }
 0x4cc   :  { %950 = vmatpush.bf16.msra.mxu1 %v932_v3 }
 0x4ce   :  { %v940_v43 = vpop.permute.xlu2 %939 }
 0x4d0   :  { %v856_v1 = vpop.permute.xlu1 %855 }
 0x4d2   :  { %v926_v2 = vpop.permute.xlu0 %925 }
 0x4d6   :  { %v1011_v46 = vpop.permute.xlu2 %1010 }
 0x4d7   :  { %v1024_v55 = vsel %vm185_vm5, %v1008_v53, %v1011_v46 }
 0x4d8   :  { %v930_v7 = vpop.permute.xlu1 %929 }
 0x4d9   :  { %951 = vmatpush.bf16.msra.mxu1 %v930_v7 }
 0x4da   :  { %v1656_v45 = vpop.permute.xlu0 %981 }
 0x4dd   :  { %952 = vmatpush.bf16.msra.mxu1 %v928_v9 }
 0x4e0   :  { %v938_v50 = vpop.permute.xlu1 %937 }
 0x4e1   :  { %953 = vmatpush.bf16.msra.mxu1 %v926_v2 }
 0x4e2   :  { %v1013_v23 = vpop.permute.xlu0 %1012 }
 0x4e3   :  { %v1025_v29 = vsel %vm185_vm5, %v1009_v49, %v1013_v23 }
 0x528   :  { %v707_v10 = vpop.f32.mrf.mxu0 }
 0x529   :  { %v802_v11 = vsel %vm185_vm5, %v707_v10, 0.0 }
 0x530   :  { %v709_v19 = vpop.f32.mrf.mxu0 }
 0x531   :  { %v809_v24 = vsel %vm185_vm5, %v709_v19, 0.0 }
 0x548   :  { %v737_v8 = vpop.f32.mrf.mxu1 }
 0x549   :  { %v803_v6 = vsel %vm185_vm5, %v737_v8, 0.0  ;;  %v767_v12 = vpop.f32.mrf.mxu2 }
 0x54a   :  { %v804_v13 = vadd.f32 %v803_v6, %v802_v11  ;;  %v805_v54 = vsel %vm185_vm5, %v767_v12, 0.0  ;;  %v797_v14 = vpop.f32.mrf.mxu3 }
 0x54b   :  { %v807_v18 = vsel %vm185_vm5, %v797_v14, 0.0  ;;  %v1170_v14 = vld [vmem:[#allocation2 + $0x28] sm:$0xf0] }
 0x54c   :  { %v806_v15 = vadd.f32 %v805_v54, %v804_v13 }
 0x54e   :  { %v808_v20 = vadd.f32 %v807_v18, %v806_v15  ;;  %v1169_v18 = vld [vmem:[#allocation2 + $0x10] sm:$0xf0] }
 0x550   :  { %v739_v21 = vpop.f32.mrf.mxu1  ;;  %v830_v22 = vadd.f32 %v826_v17, %v808_v20  ;;  %v1148_v17 = vld [vmem:[#allocation2 + $0x8] sm:$0xf] }
 0x551   :  { %v810_v62 = vsel %vm185_vm5, %v739_v21, 0.0  ;;  %v769_v25 = vpop.f32.mrf.mxu2  ;;  %v1149_v19 = vor.u32 %v1169_v18, %v1148_v17 }
 0x552   :  { %v811_v26 = vadd.f32 %v810_v62, %v809_v24  ;;  %v812_v27 = vsel %vm185_vm5, %v769_v25, 0.0  ;;  %v799_v28 = vpop.f32.mrf.mxu3  ;;  %1018 = vrot.lane.b32.xlu1 %v830_v22, %s1413_s23  ;;  %v832_v36 = vadd.f32 %v830_v22, %v1492_v39 }
 0x553   :  { %v814_v31 = vsel %vm185_vm5, %v799_v28, 0.0 }
 0x554   :  { %v813_v30 = vadd.f32 %v812_v27, %v811_v26  ;;  %v985_v27 = vsel %vm460_vm8, %v1620_v16, %v1656_v45 }
 0x556   :  { %v815_v33 = vadd.f32 %v814_v31, %v813_v30 }
 0x558   :  { %v831_v35 = vadd.f32 %v827_v34, %v815_v33 }
 0x55a   :  { %1020 = vrot.lane.b32.xlu2 %v831_v35, %s1413_s23  ;;  %v833_v41 = vadd.f32 %v831_v35, %v1494_v40  ;;  %v1661_v40 = vpop.permute.xlu1 %983 }
 0x55b   :  { %v986_v31 = vsel %vm460_vm8, %v1634_v47, %v1661_v40 }
 0x55c   :  { %v834_v42 = vpack.c.bf16 %v833_v41, %v832_v36 }
 0x55e   :  { %1128 = vmatmul.msk.bf16.vlgmr.msrb.gmra.mxu0 %vm185_vm5, %v834_v42 }
 0x5b4   :  { %v1021_v51 = vpop.permute.xlu2 %1020 }
 0x5b5   :  { %v1027_v39 = vsel %vm123_vm4, %v1025_v29, %v1021_v51 }
 0x5b6   :  { %v1030_v52 = vsel %vm1028_vm10, %v1027_v39, 0.0 }
 0x5b7   :  { %1032 = vst [vmem:[#allocation9 + $0x8] sm:$0xff] %v1030_v52 }
 0x5c4   :  { %v1019_v56 = vpop.permute.xlu1 %1018 }
 0x5c5   :  { %v1026_v38 = vsel %vm123_vm4, %v1024_v55, %v1019_v56 }
 0x5c6   :  { %v1029_v57 = vsel %vm1028_vm10, %v1026_v38, 0.0 }
 0x5c7   :  { %1031 = vst [vmem:[#allocation9] sm:$0xff] %v1029_v57 }
 0x5c8   :  { %1058 = dma.vmem_to_hbm [thread:$0]  %s1051_s14, 256, %s1053_s17, [#allocation10], %s1430_s18, %s1430_s18, %s1431_s19  }
 0x5db   :  { %v873_v44 = vpop.f32.mrf.mxu0 }
 0x5dc   :  { %v874_v58 = vadd.f32 %v873_v44, %v856_v1 }
 0x5de   :  { %v878_v37 = vmul.f32 %v874_v58, %v874_v58 }
 0x5e0   :  { %v880_v59 = vmul.f32 %v878_v37, %v874_v58 }
 0x5e2   :  { %v882_v60 = vmul.f32 0.044715, %v880_v59 }
 0x5e3   :  { %v875_v61 = vpop.f32.mrf.mxu0 }
 0x5e4   :  { %v884_v48 = vadd.f32 %v882_v60, %v874_v58  ;;  %v876_v63 = vadd.f32 %v875_v61, %v1636_v5  ;;  %v1152_v5 = vld [vmem:[#allocation2 + $0x20] sm:$0xf] }
 0x5e5   :  { %v1153_v15 = vor.u32 %v1170_v14, %v1152_v5 }
 0x5e6   :  { %v886_v0 = vmul.f32 0.7978846, %v884_v48  ;;  %v879_v3 = vmul.f32 %v876_v63, %v876_v63 }
 0x5e7   :  { %998 = vmatpush.bf16.msra.mxu2 %v1153_v15 }
 0x5e8   :  { %v881_v4 = vmul.f32 %v879_v3, %v876_v63  ;;  %1280 = vtanh.f32 %v886_v0 }
 0x5ea   :  { %v883_v32 = vmul.f32 0.044715, %v881_v4 }
 0x5eb   :  { %999 = vmatpush.bf16.msra.mxu2 %v1149_v19 }
 0x5ec   :  { %v885_v7 = vadd.f32 %v883_v32, %v876_v63 }
 0x5ee   :  { %v887_v9 = vmul.f32 0.7978846, %v885_v7  ;;  %v1281_v2 = vpop.eup %1280 }
 0x5ef   :  { %v890_v10 = vadd.f32 1.0, %v1281_v2 }
 0x5f0   :  { %1282 = vtanh.f32 %v887_v9 }
 0x5f1   :  { %v892_v11 = vmul.f32 0.5, %v890_v10 }
 0x5f3   :  { %v894_v12 = vmul.f32 %v892_v11, %v874_v58 }
 0x5f6   :  { %v1283_v8 = vpop.eup %1282 }
 0x5f7   :  { %v891_v1 = vadd.f32 1.0, %v1283_v8 }
 0x5f9   :  { %v893_v6 = vmul.f32 0.5, %v891_v1 }
 0x5fb   :  { %v895_v13 = vmul.f32 %v893_v6, %v876_v63 }
 0x5fd   :  { %v896_v54 = vpack.c.bf16 %v895_v13, %v894_v12 }
 0x5ff   :  { %1145 = vmatmul.msk.bf16.vlgmr.msra.gmra.mxu1 %vm123_vm4, %v896_v54 }
 0x67c   :  { %v955_v20 = vpop.f32.mrf.mxu1 }
 0x67d   :  { %v956_v21 = vadd.f32 %v955_v20, %v938_v50 }
 0x67f   :  { %v960_v62 = vadd.f32 %v956_v21, %v832_v36 }
 0x684   :  { %v957_v22 = vpop.f32.mrf.mxu1 }
 0x685   :  { %v958_v24 = vadd.f32 %v957_v22, %v940_v43 }
 0x687   :  { %v961_v25 = vadd.f32 %v958_v24, %v833_v41 }
 0x689   :  { %v962_v26 = vpack.c.bf16 %v961_v25, %v960_v62 }
 0x68b   :  { %1154 = vmatmul.msk.bf16.vlgmr.msra.gmra.mxu2 %vm185_vm5, %v962_v26 }
 0x70e   :  { %v1001_v28 = vpop.f32.mrf.mxu2 }
 0x70f   :  { %v1002_v30 = vadd.f32 %v1001_v28, %v985_v27 }
 0x711   :  { %1006 = vst [vmem:[#allocation8] sm:$0xff] %v1002_v30 }
 0x716   :  { %v1003_v33 = vpop.f32.mrf.mxu2 }
 0x717   :  { %v1004_v34 = vadd.f32 %v1003_v33, %v986_v31 }
 0x719   :  { %1007 = vst [vmem:[#allocation8 + $0x8] sm:$0xff] %v1004_v34 }
 0x71a   :  { %1045 = dma.vmem_to_hbm [thread:$0]  %s1038_s21, 256, %s1040_s24, [#allocation4], %s1430_s18, %s1430_s18, %s1431_s19  }
 0x71b   :  { %1408 = dma.done.wait [#allocation4], 256  }
 0x71c   :  { %1409 = vsyncadd [#allocation4], 4294967040 }
 0x71d   :  { %1410 = dma.done.wait [#allocation10], 256  }
 0x71e   :  { %1411 = vsyncadd [#allocation10], 4294967040 }
 0x71f   :  { %1067 = vsyncpa [#allocation3], 1 }
 0x720   :  { %1068 = vsyncpa [#allocation6], 1 }
 0x721   :  { %1069 = vsyncpa [#allocation4], 1 }
 0x722   :  { %1070 = vsyncpa [#allocation10], 1 }

</bundles_post_ra>
